<compile_context>
chip_gen: v5e
topology: v5e:2x2
jax: 0.10.0
libtpu: 0.0.40
codegen_flags: <defaults>
</compile_context>

<pallas_src>
import functools

import jax
import jax.numpy as jnp
from jax.experimental import pallas as pl
from jax.experimental.pallas import tpu as pltpu


def _round_up(a, b):
    return ((a + b - 1) // b) * b


def _vmem_limit_bytes():
    """Per-core VMEM budget: physical capacity minus headroom for compiler scratch."""
    cap = 64 * 1024 * 1024  # conservative fallback (== v7x physical)
    try:
        info = pltpu.get_tpu_info()
        cap = int(getattr(info, "vmem_capacity_bytes", cap) or cap)
    except Exception:
        pass
    return int(max(32 * 1024 * 1024, min(cap - 16 * 1024 * 1024, 112 * 1024 * 1024)))


# ---------------------------------------------------------------------------
# Fast path: fused shifted-matmul conv + BN + ReLU   (stride == 1, C_in >= 64)
# ---------------------------------------------------------------------------

def _fused_conv_bn_kernel(x_ref, w_ref, scale_ref, shift_ref, o_ref, *,
                          kh, kw, dilation, w_row, tm, num_m_tiles, activation):
    # x_ref:     (L, C_in)           flattened padded NHWC image (resident per batch elem)
    # w_ref:     (KH, KW, C_in, tn)  conv weights (bf16, un-scaled)
    # scale_ref: (1, tn)             gamma * rsqrt(var + eps)        (f32)
    # shift_ref: (1, tn)             beta - (mean - bias) * scale    (f32)
    # o_ref:     (tm, tn)            flattened-spatial x channel output tile
    if num_m_tiles == 1:
        m0 = 0                                         # fully static offsets
    else:
        m0 = pl.multiple_of(pl.program_id(2) * tm, 16)

    # Value accumulation: lets Mosaic chain the dots (MRB accumulate on v7x) instead of
    # a (tm, tn) f32 VMEM load+store per tap.
    acc = None
    for i in range(kh):
        for j in range(kw):
            off = i * dilation * w_row + j * dilation
            patch = x_ref[pl.ds(m0 + off, tm), :]                  # (tm, C_in) bf16
            d = jnp.dot(patch, w_ref[i, j], preferred_element_type=jnp.float32)
            acc = d if acc is None else acc + d

    y = acc * scale_ref[...] + shift_ref[...]          # BN on the f32 accumulator
    if activation:
        y = jnp.maximum(y, 0.0)
    o_ref[...] = y.astype(o_ref.dtype)


def _fused_conv_path(x, weight, scale, shift, *, padding, dilation, oh, ow,
                     cp, tn, activation, tm, compute_dtype, out_dtype, vmem_limit):
    n, c_in, h, w = x.shape
    c_out, _, kh, kw = weight.shape

    # Row stride padded to the bf16 sublane packing so kh-direction shifts are aligned.
    w_row = _round_up(w + 2 * padding, 16)
    mo = oh * w_row                           # flattened output positions (incl. ragged cols)

    if vmem_limit >= 96 * 1024 * 1024 and mo >= 4096:
        tm = max(tm, 1024)                    # larger tiles when VMEM allows (v5e/v6e)
    tm_eff = min(_round_up(tm, 16), _round_up(mo, 16))
    mo_pad = _round_up(mo, tm_eff)
    num_m_tiles = mo_pad // tm_eff
    # Keep >= 2 tiles across the parallel axes so both v7x TensorCores get work.
    if n * (cp // tn) * num_m_tiles < 2 and mo > 16:
        tm_eff = _round_up(-(-mo // 2), 16)
        mo_pad = _round_up(mo, tm_eff)
        num_m_tiles = mo_pad // tm_eff

    max_off = (kh - 1) * dilation * w_row + (kw - 1) * dilation
    # Enough zero-padded rows so every shifted (tm, C_in) slice stays in-bounds:
    # the furthest read index is mo_pad + max_off - 1.
    rows = max(h + 2 * padding, -(-(mo_pad + max_off) // w_row))

    # NCHW -> flattened padded NHWC, bf16.
    # TODO(synk): an NHWC-native entry point would remove this transpose + the one below.
    x_nhwc = jnp.transpose(x, (0, 2, 3, 1)).astype(compute_dtype)
    x_pad = jnp.pad(x_nhwc, ((0, 0),
                             (padding, rows - h - padding),
                             (padding, w_row - w - padding),
                             (0, 0)))
    x_flat = x_pad.reshape(n, rows * w_row, c_in)

    # (C_out, C_in, KH, KW) -> (KH, KW, C_in, Cp), bf16; BN stays in the f32 epilogue.
    w_r = jnp.transpose(weight, (2, 3, 1, 0)).astype(compute_dtype)
    w_p = jnp.pad(w_r, ((0, 0), (0, 0), (0, 0), (0, cp - c_out)))
    scale_p = jnp.pad(scale.reshape(1, c_out), ((0, 0), (0, cp - c_out)))
    shift_p = jnp.pad(shift.reshape(1, c_out), ((0, 0), (0, cp - c_out)))

    kernel = functools.partial(
        _fused_conv_bn_kernel, kh=kh, kw=kw, dilation=dilation, w_row=w_row,
        tm=tm_eff, num_m_tiles=num_m_tiles, activation=activation)

    out_full = pl.pallas_call(
        kernel,
        out_shape=jax.ShapeDtypeStruct((n, mo_pad, cp), out_dtype),
        grid=(n, cp // tn, num_m_tiles),
        in_specs=[
            # TODO(synk): pipeline_mode=pl.Buffered(1) on this resident slab would halve
            # its footprint on v7x (its block index only changes once per batch element).
            pl.BlockSpec((None, rows * w_row, c_in), lambda b, c, m: (b, 0, 0)),
            pl.BlockSpec((kh, kw, c_in, tn), lambda b, c, m: (0, 0, 0, c)),
            pl.BlockSpec((1, tn), lambda b, c, m: (0, c)),
            pl.BlockSpec((1, tn), lambda b, c, m: (0, c)),
        ],
        out_specs=pl.BlockSpec((None, tm_eff, tn), lambda b, c, m: (b, m, c)),
        compiler_params=pltpu.CompilerParams(
            dimension_semantics=("parallel", "parallel", "parallel"),
            vmem_limit_bytes=vmem_limit),
    )(x_flat, w_p, scale_p, shift_p)

    out = out_full[:, :oh * w_row, :c_out]
    out = out.reshape(n, oh, w_row, c_out)[:, :, :ow, :]     # drop ragged columns
    return jnp.transpose(out, (0, 3, 1, 2)).astype(out_dtype)


# ---------------------------------------------------------------------------
# im2col path: single gather + K-tiled matmul + BN + ReLU
#   (used for stride > 1 and for small-C_in stride-1 layers)
# ---------------------------------------------------------------------------

def _matmul_bn_kernel(p_ref, w_ref, scale_ref, shift_ref, o_ref, acc_ref, *, activation):
    kk = pl.program_id(2)

    @pl.when(kk == 0)
    def _():
        acc_ref[...] = jnp.zeros_like(acc_ref)

    acc_ref[...] += jnp.dot(p_ref[...], w_ref[...], preferred_element_type=jnp.float32)

    @pl.when(kk == pl.num_programs(2) - 1)
    def _():
        y = acc_ref[...] * scale_ref[...] + shift_ref[...]
        if activation:
            y = jnp.maximum(y, 0.0)
        o_ref[...] = y.astype(o_ref.dtype)


def _im2col_conv_path(x, weight, scale, shift, *, stride, padding, dilation, oh, ow,
                      cp, tn, activation, tm, compute_dtype, out_dtype, vmem_limit):
    n, c_in, h, w = x.shape
    c_out, _, kh, kw = weight.shape
    k = c_in * kh * kw
    m = n * oh * ow

    # Single-pass patch gather; K is ordered (C_in, KH, KW), matching weight.reshape.
    patches = jax.lax.conv_general_dilated_patches(
        x.astype(compute_dtype), (kh, kw), (stride, stride),
        padding=((padding, padding), (padding, padding)),
        rhs_dilation=(dilation, dilation),
        dimension_numbers=("NCHW", "OIHW", "NCHW"))           # (N, K, OH, OW)
    patches = jnp.transpose(patches, (0, 2, 3, 1)).reshape(m, k)

    w_mat = weight.reshape(c_out, k).T.astype(compute_dtype)  # (K, C_out), un-scaled bf16
    w_p = jnp.pad(w_mat, ((0, 0), (0, cp - c_out)))
    scale_p = jnp.pad(scale.reshape(1, c_out), ((0, 0), (0, cp - c_out)))
    shift_p = jnp.pad(shift.reshape(1, c_out), ((0, 0), (0, cp - c_out)))

    tm_eff = min(_round_up(tm, 16), _round_up(m, 16))
    m_pad = _round_up(m, tm_eff)

    # K tiling: a single full-K block for small K; otherwise 128-multiple K tiles on a
    # third "arbitrary" grid axis with a VMEM f32 accumulator (keeps footprint bounded).
    if k <= 2048:
        k_pad, tk_eff = k, k
    else:
        k_pad = _round_up(k, 128)
        tk_eff = 512 if k_pad % 512 == 0 else (256 if k_pad % 256 == 0 else 128)
    num_k = k_pad // tk_eff

    if m_pad != m or k_pad != k:
        patches = jnp.pad(patches, ((0, m_pad - m), (0, k_pad - k)))
    if k_pad != k:
        w_p = jnp.pad(w_p, ((0, k_pad - k), (0, 0)))

    kernel = functools.partial(_matmul_bn_kernel, activation=activation)
    out_flat = pl.pallas_call(
        kernel,
        out_shape=jax.ShapeDtypeStruct((m_pad, cp), out_dtype),
        grid=(m_pad // tm_eff, cp // tn, num_k),
        in_specs=[
            pl.BlockSpec((tm_eff, tk_eff), lambda i, c, kk: (i, kk)),
            pl.BlockSpec((tk_eff, tn), lambda i, c, kk: (kk, c)),
            pl.BlockSpec((1, tn), lambda i, c, kk: (0, c)),
            pl.BlockSpec((1, tn), lambda i, c, kk: (0, c)),
        ],
        out_specs=pl.BlockSpec((tm_eff, tn), lambda i, c, kk: (i, c)),
        scratch_shapes=[pltpu.VMEM((tm_eff, tn), jnp.float32)],
        compiler_params=pltpu.CompilerParams(
            dimension_semantics=("parallel", "parallel", "arbitrary"),
            vmem_limit_bytes=vmem_limit),
    )(patches, w_p, scale_p, shift_p)

    out = out_flat[:m, :c_out].reshape(n, oh, ow, c_out)
    return jnp.transpose(out, (0, 3, 1, 2)).astype(out_dtype)


# ---------------------------------------------------------------------------
# Public wrapper (matches BN_Conv2d forward semantics, inference-mode BN)
# ---------------------------------------------------------------------------

def bn_conv2d(x, weight, gamma, beta, running_mean, running_var, *,
              stride=1, padding=0, dilation=1, groups=1, conv_bias=None,
              eps=1e-5, activation=True, tm=512, min_cin_fused=64,
              compute_dtype=jnp.bfloat16, out_dtype=None):
    """Fused Conv2d + BatchNorm2d(inference) + optional ReLU.  NCHW in / NCHW out."""
    n, c_in, h, w = x.shape
    c_out, c_in_w, kh, kw = weight.shape
    if groups != 1:
        raise NotImplementedError("groups != 1")  # TODO(synk): grouped conv
    assert c_in == c_in_w
    # TODO(synk): training-mode BatchNorm (batch statistics) is not implemented.

    oh = (h + 2 * padding - dilation * (kh - 1) - 1) // stride + 1
    ow = (w + 2 * padding - dilation * (kw - 1) - 1) // stride + 1

    # Inference BatchNorm as a per-output-channel affine, applied on the f32
    # accumulator in the kernel epilogue (not baked into bf16 weights).
    scale = gamma.astype(jnp.float32) * jax.lax.rsqrt(
        running_var.astype(jnp.float32) + eps)
    mean = running_mean.astype(jnp.float32)
    if conv_bias is not None:
        mean = mean - conv_bias.astype(jnp.float32)
    shift = beta.astype(jnp.float32) - mean * scale

    cp = _round_up(c_out, 128)                 # lane-dense, padded output channels
    tn = 256 if cp % 256 == 0 else 128         # MXU-friendly on all generations
    vmem_limit = _vmem_limit_bytes()

    common = dict(padding=padding, dilation=dilation, oh=oh, ow=ow, cp=cp, tn=tn,
                  activation=activation, tm=tm, compute_dtype=compute_dtype,
                  out_dtype=out_dtype if out_dtype is not None else x.dtype,
                  vmem_limit=vmem_limit)
    # Per-tap K = C_in badly under-fills the MXU for small C_in; those layers go
    # through the im2col path where the contraction depth is C_in*KH*KW.
    if stride == 1 and c_in >= min_cin_fused:
        return _fused_conv_path(x, weight, scale, shift, **common)
    return _im2col_conv_path(x, weight, scale, shift, stride=stride, **common)


if __name__ == "__main__":
    key = jax.random.PRNGKey(0)
    EPS = 1e-5

    def make_params(k, c_in, c_out, kh, kw):
        k_w, k_g, k_b, k_m, k_v = jax.random.split(k, 5)
        weight = jax.random.normal(k_w, (c_out, c_in, kh, kw), dtype=jnp.float32) * 0.1
        gamma = 1.0 + 0.1 * jax.random.normal(k_g, (c_out,), dtype=jnp.float32)
        beta = 0.1 * jax.random.normal(k_b, (c_out,), dtype=jnp.float32)
        mean = 0.1 * jax.random.normal(k_m, (c_out,), dtype=jnp.float32)
        var = jnp.abs(jax.random.normal(k_v, (c_out,), dtype=jnp.float32)) + 0.5
        return weight, gamma, beta, mean, var

    def reference(x_, weight, gamma, beta, mean, var, *, stride, padding, dilation,
                  activation):
        # bf16-rounded conv inputs + f32 accumulate/BN, matching the kernel precision.
        xb = x_.astype(jnp.bfloat16).astype(jnp.float32)
        wb = weight.astype(jnp.bfloat16).astype(jnp.float32)
        y = jax.lax.conv_general_dilated(
            xb, wb, window_strides=(stride, stride),
            padding=((padding, padding), (padding, padding)),
            rhs_dilation=(dilation, dilation),
            dimension_numbers=("NCHW", "OIHW", "NCHW"))
        s = (gamma * jax.lax.rsqrt(var + EPS)).reshape(1, -1, 1, 1)
        b = (beta - mean * gamma * jax.lax.rsqrt(var + EPS)).reshape(1, -1, 1, 1)
        y = y * s + b
        return jnp.maximum(y, 0.0) if activation else y

    def check(name, x_, params, **kw):
        weight, gamma, beta, mean, var = params
        y = bn_conv2d(x_, weight, gamma, beta, mean, var, **kw)
        y = jax.block_until_ready(y)
        ref = reference(x_, weight, gamma, beta, mean, var,
                        stride=kw.get("stride", 1), padding=kw.get("padding", 0),
                        dilation=kw.get("dilation", 1),
                        activation=kw.get("activation", True))
        assert y.shape == ref.shape, (name, y.shape, ref.shape)
        err = float(jnp.max(jnp.abs(y - ref)))
        assert jnp.allclose(y, ref, atol=2e-2, rtol=2e-2), (name, err)

    keys = jax.random.split(key, 6)

    # 1) im2col path: BN_Conv2d(4, 8, 3, stride=1, padding=1) with ReLU.
    x1 = jax.random.normal(keys[0], (2, 4, 16, 16), dtype=jnp.float32)
    p1 = make_params(keys[1], 4, 8, 3, 3)
    check("im2col_s1", x1, p1, stride=1, padding=1, dilation=1, activation=True)

    # 2) fused shifted-matmul path: C_in=64, stride=1, padding=1, ReLU.
    x2 = jax.random.normal(keys[2], (2, 64, 16, 16), dtype=jnp.float32)
    p2 = make_params(keys[3], 64, 16, 3, 3)
    check("fused_s1", x2, p2, stride=1, padding=1, dilation=1, activation=True)

    # 3) strided im2col path: stride=2, no activation.
    check("im2col_s2", x1, p1, stride=2, padding=1, dilation=1, activation=False)

    # 4) fused-path bounds sweep over (padding, dilation), incl. multi-m-tile case (N=1).
    x4 = jax.random.normal(keys[4], (1, 64, 12, 12), dtype=jnp.float32)
    p4 = make_params(keys[5], 64, 8, 3, 3)
    check("fused_p0_d1", x4, p4, stride=1, padding=0, dilation=1, activation=True)
    check("fused_p2_d2", x4, p4, stride=1, padding=2, dilation=2, activation=False)

    print("KERNEL_OK")
</pallas_src>

<mosaic_0001>
module attributes {stable_mosaic.version = 11 : i64} {
  func.func @_matmul_bn_kernel(%arg0: i32, %arg1: i32, %arg2: i32, %arg3: memref<512x36xbf16, #tpu.memory_space<vmem>>, %arg4: memref<36x128xbf16, #tpu.memory_space<vmem>>, %arg5: memref<1x128xf32, #tpu.memory_space<vmem>>, %arg6: memref<1x128xf32, #tpu.memory_space<vmem>>, %arg7: memref<512x128xf32, #tpu.memory_space<vmem>>, %arg8: memref<512x128xf32, #tpu.memory_space<vmem>>) attributes {dimension_semantics = [#tpu.dimension_semantics<parallel>, #tpu.dimension_semantics<parallel>, #tpu.dimension_semantics<arbitrary>], iteration_bounds = array<i64: 1, 1, 1>, scalar_prefetch = 0 : i64, scratch_operands = 1 : i64, tpu.core_type = #tpu.core_type<tc>, window_params = [{transform_indices = @transform_0, window_bounds = array<i64: 512, 36>}, {transform_indices = @transform_1, window_bounds = array<i64: 36, 128>}, {transform_indices = @transform_2, window_bounds = array<i64: 1, 128>}, {transform_indices = @transform_3, window_bounds = array<i64: 1, 128>}, {transform_indices = @transform_4, window_bounds = array<i64: 512, 128>}]} {
    %c0_i32 = arith.constant 0 : i32
    %0 = arith.cmpi eq, %arg2, %c0_i32 : i32
    %1 = arith.extui %0 : i1 to i32
    %c0_i32_0 = arith.constant 0 : i32
    %2 = arith.cmpi ne, %1, %c0_i32_0 : i32
    scf.if %2 {
      %cst_10 = arith.constant 0.000000e+00 : f32
      %12 = vector.broadcast %cst_10 : f32 to vector<512x128xf32>
      %c0_11 = arith.constant 0 : index
      %c0_12 = arith.constant 0 : index
      %13 = vector.load %arg8[%c0_11, %c0_12] : memref<512x128xf32, #tpu.memory_space<vmem>>, vector<512x128xf32>
      tpu.vector_store %arg8[%c0_11, %c0_12], %12 {strides = array<i32>} : memref<512x128xf32, #tpu.memory_space<vmem>>, vector<512x128xf32>,
    } else {
    }
    %c0 = arith.constant 0 : index
    %c0_1 = arith.constant 0 : index
    %3 = vector.load %arg8[%c0, %c0_1] : memref<512x128xf32, #tpu.memory_space<vmem>>, vector<512x128xf32>
    %c0_2 = arith.constant 0 : index
    %c0_3 = arith.constant 0 : index
    %4 = vector.load %arg3[%c0_2, %c0_3] : memref<512x36xbf16, #tpu.memory_space<vmem>>, vector<512x36xbf16>
    %c0_4 = arith.constant 0 : index
    %c0_5 = arith.constant 0 : index
    %5 = vector.load %arg4[%c0_4, %c0_5] : memref<36x128xbf16, #tpu.memory_space<vmem>>, vector<36x128xbf16>
    %cst = arith.constant dense<0.000000e+00> : vector<512x128xf32>
    %6 = tpu.matmul %4, %5, %cst {dimension_numbers = #tpu.dot_dimension_numbers<[1], [0], [0], [1], [0, 0, 1, 1], [], []>} : vector<512x36xbf16>, vector<36x128xbf16>, vector<512x128xf32> -> vector<512x128xf32>
    %7 = arith.addf %3, %6 : vector<512x128xf32>
    %c0_6 = arith.constant 0 : index
    %c0_7 = arith.constant 0 : index
    %8 = vector.load %arg8[%c0_6, %c0_7] : memref<512x128xf32, #tpu.memory_space<vmem>>, vector<512x128xf32>
    tpu.vector_store %arg8[%c0_6, %c0_7], %7 {strides = array<i32>} : memref<512x128xf32, #tpu.memory_space<vmem>>, vector<512x128xf32>,
    %c0_i32_8 = arith.constant 0 : i32
    %9 = arith.cmpi eq, %arg2, %c0_i32_8 : i32
    %10 = arith.extui %9 : i1 to i32
    %c0_i32_9 = arith.constant 0 : i32
    %11 = arith.cmpi ne, %10, %c0_i32_9 : i32
    scf.if %11 {
      %c0_10 = arith.constant 0 : index
      %c0_11 = arith.constant 0 : index
      %12 = vector.load %arg8[%c0_10, %c0_11] : memref<512x128xf32, #tpu.memory_space<vmem>>, vector<512x128xf32>
      %c0_12 = arith.constant 0 : index
      %c0_13 = arith.constant 0 : index
      %13 = vector.load %arg5[%c0_12, %c0_13] : memref<1x128xf32, #tpu.memory_space<vmem>>, vector<1x128xf32>
      %14 = vector.broadcast %13 : vector<1x128xf32> to vector<512x128xf32>
      %15 = arith.mulf %12, %14 : vector<512x128xf32>
      %c0_14 = arith.constant 0 : index
      %c0_15 = arith.constant 0 : index
      %16 = vector.load %arg6[%c0_14, %c0_15] : memref<1x128xf32, #tpu.memory_space<vmem>>, vector<1x128xf32>
      %17 = vector.broadcast %16 : vector<1x128xf32> to vector<512x128xf32>
      %18 = arith.addf %15, %17 : vector<512x128xf32>
      %cst_16 = arith.constant 0.000000e+00 : f32
      %19 = vector.broadcast %cst_16 : f32 to vector<512x128xf32>
      %20 = arith.maximumf %18, %19 : vector<512x128xf32>
      %c0_17 = arith.constant 0 : index
      %c0_18 = arith.constant 0 : index
      %21 = vector.load %arg7[%c0_17, %c0_18] : memref<512x128xf32, #tpu.memory_space<vmem>>, vector<512x128xf32>
      tpu.vector_store %arg7[%c0_17, %c0_18], %20 {strides = array<i32>} : memref<512x128xf32, #tpu.memory_space<vmem>>, vector<512x128xf32>,
    } else {
    }
    return
  }
  func.func @transform_0(%arg0: i32, %arg1: i32, %arg2: i32) -> (i32, i32) {
    %c0_i32 = arith.constant 0 : i32
    return %arg0, %arg2 : i32, i32
  }
  func.func @transform_1(%arg0: i32, %arg1: i32, %arg2: i32) -> (i32, i32) {
    %c0_i32 = arith.constant 0 : i32
    return %arg2, %arg1 : i32, i32
  }
  func.func @transform_2(%arg0: i32, %arg1: i32, %arg2: i32) -> (i32, i32) {
    %c0_i32 = arith.constant 0 : i32
    %c0_i32_0 = arith.constant 0 : i32
    return %c0_i32, %arg1 : i32, i32
  }
  func.func @transform_3(%arg0: i32, %arg1: i32, %arg2: i32) -> (i32, i32) {
    %c0_i32 = arith.constant 0 : i32
    %c0_i32_0 = arith.constant 0 : i32
    return %c0_i32, %arg1 : i32, i32
  }
  func.func @transform_4(%arg0: i32, %arg1: i32, %arg2: i32) -> (i32, i32) {
    %c0_i32 = arith.constant 0 : i32
    return %arg0, %arg1 : i32, i32
  }
}

</mosaic_0001>

<bundles_post_ra>
// kernel: tpu_custom_call.1
= control target key start
LH: loop header
LB: loop body
LE: loop exit
PB: predicated region body
PF: predicated region fallthrough
CT: control target
= control target key end

     0   :  { %vm492_vm0 = vcmask 1041408   ;;  %s1690_s0 = inlined_call_operand.vmem [shape: bf16[512,36], index: 0, kind: input, shape index: {}]   ;;  %s1691_s1 = inlined_call_operand.vmem [shape: bf16[36,128], index: 1, kind: input, shape index: {}]   ;;  %s1692_s2 = inlined_call_operand.vmem [shape: f32[1,128], index: 2, kind: input, shape index: {}]   ;;  %s1693_s3 = inlined_call_operand.vmem [shape: f32[1,128], index: 3, kind: input, shape index: {}]   ;;  %s1694_s4 = inlined_call_operand.hbm [shape: f32[512,128], index: 4, kind: output, shape index: {}]  }
   0x1   :  { %v219_v0 = vld [vmem:[%s1691_s1 + $0x10] sm:$0x3] }
   0x2   :  { %v389_v1 = vunpack.c.l.b16 %v219_v0 }
   0x4   :  { %v392_v2 = vpack.c.b16 %v389_v1, %v389_v1 }
   0x5   :  { %9 = vsyncpa [#allocation4], 0  ;;  %v1343_v4 = vld [vmem:[%s1691_s1 + $0x8] sm:$0xff]  ;;  %v1342_v5 = vld [vmem:[%s1691_s1] sm:$0xff]  ;;  %vm395_vm1 = vcmask 293888   ;;  %s1130_s9 = sshll.u32 %s1694_s4, 4  ;;  %s1131_s9 = int_to_ptr.hbm [resolvable:$true] %s1130_s9 }
   0x6   :  { %v494_v3 = vsel %vm492_vm0, %v392_v2, 0  ;;  %v1310_v6 = vld [vmem:[%s1690_s0] sm:$0xff]  ;;  %v1311_v10 = vld [vmem:[%s1690_s0 + $0x8] sm:$0xff]  ;;  %v1312_v14 = vld [vmem:[%s1690_s0 + $0x10] sm:$0xff]  ;;  %s1385_s10 = smov 128   ;;  %s1386_s11 = smov 8  }
   0x7   :  { %501 = vmatpush.bf16.msra.mxu0 %v494_v3  ;;  %1344 = vmatpush.bf16.msra.mxu1 %v494_v3  ;;  %v1318_v7 = vld [vmem:[%s1690_s0 + $0x40] sm:$0xff]  ;;  %v1319_v11 = vld [vmem:[%s1690_s0 + $0x48] sm:$0xff]  ;;  %v1320_v15 = vld [vmem:[%s1690_s0 + $0x50] sm:$0xff] }
   0x8   :  { %1345 = vmatpush.bf16.msra.mxu2 %v494_v3  ;;  %1346 = vmatpush.bf16.msra.mxu3 %v494_v3  ;;  %v1326_v8 = vld [vmem:[%s1690_s0 + $0x80] sm:$0xff]  ;;  %v1327_v12 = vld [vmem:[%s1690_s0 + $0x88] sm:$0xff]  ;;  %v1328_v16 = vld [vmem:[%s1690_s0 + $0x90] sm:$0xff] }
   0x9   :  { %v1334_v9 = vld [vmem:[%s1690_s0 + $0xc0] sm:$0xff]  ;;  %v1335_v13 = vld [vmem:[%s1690_s0 + $0xc8] sm:$0xff]  ;;  %v1336_v17 = vld [vmem:[%s1690_s0 + $0xd0] sm:$0xff] }
   0xa   :  { %v1313_v18 = vld [vmem:[%s1690_s0 + $0x18] sm:$0xff]  ;;  %v1314_v22 = vld [vmem:[%s1690_s0 + $0x20] sm:$0xff]  ;;  %v1315_v26 = vld [vmem:[%s1690_s0 + $0x28] sm:$0xff] }
   0xb   :  { %502 = vmatpush.bf16.msra.mxu0 %v1343_v4  ;;  %1347 = vmatpush.bf16.msra.mxu1 %v1343_v4  ;;  %v1321_v19 = vld [vmem:[%s1690_s0 + $0x58] sm:$0xff]  ;;  %v1322_v23 = vld [vmem:[%s1690_s0 + $0x60] sm:$0xff]  ;;  %v1323_v27 = vld [vmem:[%s1690_s0 + $0x68] sm:$0xff] }
   0xc   :  { %1348 = vmatpush.bf16.msra.mxu2 %v1343_v4  ;;  %1349 = vmatpush.bf16.msra.mxu3 %v1343_v4  ;;  %v1329_v20 = vld [vmem:[%s1690_s0 + $0x98] sm:$0xff]  ;;  %v1330_v24 = vld [vmem:[%s1690_s0 + $0xa0] sm:$0xff]  ;;  %v1331_v28 = vld [vmem:[%s1690_s0 + $0xa8] sm:$0xff] }
   0xd   :  { %v1337_v21 = vld [vmem:[%s1690_s0 + $0xd8] sm:$0xff]  ;;  %v1338_v25 = vld [vmem:[%s1690_s0 + $0xe0] sm:$0xff]  ;;  %v1339_v29 = vld [vmem:[%s1690_s0 + $0xe8] sm:$0xff] }
   0xe   :  { %v1316_v30 = vld [vmem:[%s1690_s0 + $0x30] sm:$0xff]  ;;  %v1317_v34 = vld [vmem:[%s1690_s0 + $0x38] sm:$0xff]  ;;  %v1552_v38 = vld [vmem:[%s1692_s2] ss:$0 sm:$0xff] }
   0xf   :  { %503 = vmatpush.bf16.msra.mxu0 %v1342_v5  ;;  %1350 = vmatpush.bf16.msra.mxu1 %v1342_v5  ;;  %v1324_v31 = vld [vmem:[%s1690_s0 + $0x70] sm:$0xff]  ;;  %v1325_v35 = vld [vmem:[%s1690_s0 + $0x78] sm:$0xff]  ;;  %v1557_v39 = vld [vmem:[%s1693_s3] ss:$0 sm:$0xff] }
  0x10   :  { %1351 = vmatpush.bf16.msra.mxu2 %v1342_v5  ;;  %1352 = vmatpush.bf16.msra.mxu3 %v1342_v5  ;;  %v1332_v32 = vld [vmem:[%s1690_s0 + $0xb0] sm:$0xff]  ;;  %v1333_v36 = vld [vmem:[%s1690_s0 + $0xb8] sm:$0xff] }
  0x11   :  { %v1340_v33 = vld [vmem:[%s1690_s0 + $0xf0] sm:$0xff]  ;;  %v1341_v37 = vld [vmem:[%s1690_s0 + $0xf8] sm:$0xff]  ;;  %s1384_s0 = smov [#allocation3]  }
  0x12   :  { %1278 = vmatmul.msk.bf16.vlgmr.msra.gmra.mxu0 %vm395_vm1, %v1310_v6  ;;  %1286 = vmatmul.msk.bf16.vlgmr.msra.gmra.mxu1 %vm395_vm1, %v1318_v7  ;;  %s1128_s2 = sshll.u32 %s1384_s0, 4  ;;  %s1129_s2 = int_to_ptr.vmem [resolvable:$true] %s1128_s2 }
  0x13   :  { %1294 = vmatmul.msk.bf16.vlgmr.msra.gmra.mxu2 %vm395_vm1, %v1326_v8  ;;  %1302 = vmatmul.msk.bf16.vlgmr.msra.gmra.mxu3 %vm395_vm1, %v1334_v9 }
  0x22   :  { %1279 = vmatmul.msk.bf16.gmra.mxu0 %vm395_vm1, %v1311_v10  ;;  %1287 = vmatmul.msk.bf16.gmra.mxu1 %vm395_vm1, %v1319_v11 }
  0x23   :  { %1295 = vmatmul.msk.bf16.gmra.mxu2 %vm395_vm1, %v1327_v12  ;;  %1303 = vmatmul.msk.bf16.gmra.mxu3 %vm395_vm1, %v1335_v13 }
  0x32   :  { %1280 = vmatmul.msk.bf16.gmra.mxu0 %vm395_vm1, %v1312_v14  ;;  %1288 = vmatmul.msk.bf16.gmra.mxu1 %vm395_vm1, %v1320_v15 }
  0x33   :  { %1296 = vmatmul.msk.bf16.gmra.mxu2 %vm395_vm1, %v1328_v16  ;;  %1304 = vmatmul.msk.bf16.gmra.mxu3 %vm395_vm1, %v1336_v17 }
  0x42   :  { %1281 = vmatmul.msk.bf16.gmra.mxu0 %vm395_vm1, %v1313_v18  ;;  %1289 = vmatmul.msk.bf16.gmra.mxu1 %vm395_vm1, %v1321_v19 }
  0x43   :  { %1297 = vmatmul.msk.bf16.gmra.mxu2 %vm395_vm1, %v1329_v20  ;;  %1305 = vmatmul.msk.bf16.gmra.mxu3 %vm395_vm1, %v1337_v21 }
  0x52   :  { %1282 = vmatmul.msk.bf16.gmra.mxu0 %vm395_vm1, %v1314_v22  ;;  %1290 = vmatmul.msk.bf16.gmra.mxu1 %vm395_vm1, %v1322_v23 }
  0x53   :  { %1298 = vmatmul.msk.bf16.gmra.mxu2 %vm395_vm1, %v1330_v24  ;;  %1306 = vmatmul.msk.bf16.gmra.mxu3 %vm395_vm1, %v1338_v25 }
  0x62   :  { %1283 = vmatmul.msk.bf16.gmra.mxu0 %vm395_vm1, %v1315_v26  ;;  %1291 = vmatmul.msk.bf16.gmra.mxu1 %vm395_vm1, %v1323_v27 }
  0x63   :  { %1299 = vmatmul.msk.bf16.gmra.mxu2 %vm395_vm1, %v1331_v28  ;;  %1307 = vmatmul.msk.bf16.gmra.mxu3 %vm395_vm1, %v1339_v29 }
  0x72   :  { %1284 = vmatmul.msk.bf16.gmra.mxu0 %vm395_vm1, %v1316_v30  ;;  %1292 = vmatmul.msk.bf16.gmra.mxu1 %vm395_vm1, %v1324_v31 }
  0x73   :  { %1300 = vmatmul.msk.bf16.gmra.mxu2 %vm395_vm1, %v1332_v32  ;;  %1308 = vmatmul.msk.bf16.gmra.mxu3 %vm395_vm1, %v1340_v33 }
  0x82   :  { %1285 = vmatmul.msk.bf16.gmra.mxu0 %vm395_vm1, %v1317_v34  ;;  %1293 = vmatmul.msk.bf16.gmra.mxu1 %vm395_vm1, %v1325_v35 }
  0x83   :  { %1301 = vmatmul.msk.bf16.gmra.mxu2 %vm395_vm1, %v1333_v36  ;;  %1309 = vmatmul.msk.bf16.gmra.mxu3 %vm395_vm1, %v1341_v37 }
  0x8f   :  { %v505_v40 = vpop.f32.mrf.mxu0  ;;  %v545_v41 = vpop.f32.mrf.mxu1 }
  0x90   :  { %v864_v42 = vmul.f32 %v1552_v38, %v505_v40  ;;  %v880_v43 = vmul.f32 %v1552_v38, %v545_v41 }
  0x92   :  { %v932_v44 = vadd.f32 %v1557_v39, %v864_v42  ;;  %v948_v45 = vadd.f32 %v1557_v39, %v880_v43 }
  0x94   :  { %v996_v46 = vmax.f32 %v932_v44, 0.0  ;;  %v1012_v47 = vmax.f32 %v948_v45, 0.0 }
  0x96   :  { %1060 = vst [vmem:[#allocation3] sm:$0xff] %v996_v46  ;;  %v585_v48 = vpop.f32.mrf.mxu2  ;;  %v625_v49 = vpop.f32.mrf.mxu3 }
  0x97   :  { %1076 = vst [vmem:[#allocation3 + $0x80] sm:$0xff] %v1012_v47  ;;  %v896_v50 = vmul.f32 %v1552_v38, %v585_v48  ;;  %v912_v51 = vmul.f32 %v1552_v38, %v625_v49  ;;  %v507_v52 = vpop.f32.mrf.mxu0  ;;  %v547_v53 = vpop.f32.mrf.mxu1 }
  0x98   :  { %v865_v54 = vmul.f32 %v1552_v38, %v507_v52  ;;  %v881_v55 = vmul.f32 %v1552_v38, %v547_v53 }
  0x99   :  { %v964_v56 = vadd.f32 %v1557_v39, %v896_v50  ;;  %v980_v57 = vadd.f32 %v1557_v39, %v912_v51 }
  0x9a   :  { %v933_v58 = vadd.f32 %v1557_v39, %v865_v54  ;;  %v949_v59 = vadd.f32 %v1557_v39, %v881_v55 }
  0x9b   :  { %v1028_v60 = vmax.f32 %v964_v56, 0.0  ;;  %v1044_v61 = vmax.f32 %v980_v57, 0.0 }
  0x9c   :  { %v997_v62 = vmax.f32 %v933_v58, 0.0  ;;  %v1013_v63 = vmax.f32 %v949_v59, 0.0 }
  0x9d   :  { %1092 = vst [vmem:[#allocation3 + $0x100] sm:$0xff] %v1028_v60 }
  0x9e   :  { %1108 = vst [vmem:[#allocation3 + $0x180] sm:$0xff] %v1044_v61  ;;  %v587_v0 = vpop.f32.mrf.mxu2  ;;  %v627_v1 = vpop.f32.mrf.mxu3 }
  0x9f   :  { %1061 = vst [vmem:[#allocation3 + $0x8] sm:$0xff] %v997_v62  ;;  %v897_v2 = vmul.f32 %v1552_v38, %v587_v0  ;;  %v913_v3 = vmul.f32 %v1552_v38, %v627_v1  ;;  %v510_v4 = vpop.f32.mrf.mxu0  ;;  %v550_v5 = vpop.f32.mrf.mxu1 }
  0xa0   :  { %1077 = vst [vmem:[#allocation3 + $0x88] sm:$0xff] %v1013_v63  ;;  %v866_v6 = vmul.f32 %v1552_v38, %v510_v4  ;;  %v882_v7 = vmul.f32 %v1552_v38, %v550_v5 }
  0xa1   :  { %v965_v8 = vadd.f32 %v1557_v39, %v897_v2  ;;  %v981_v9 = vadd.f32 %v1557_v39, %v913_v3 }
  0xa2   :  { %v934_v10 = vadd.f32 %v1557_v39, %v866_v6  ;;  %v950_v11 = vadd.f32 %v1557_v39, %v882_v7 }
  0xa3   :  { %v1029_v12 = vmax.f32 %v965_v8, 0.0  ;;  %v1045_v13 = vmax.f32 %v981_v9, 0.0 }
  0xa4   :  { %v998_v14 = vmax.f32 %v934_v10, 0.0  ;;  %v1014_v15 = vmax.f32 %v950_v11, 0.0 }
  0xa5   :  { %1093 = vst [vmem:[#allocation3 + $0x108] sm:$0xff] %v1029_v12 }
  0xa6   :  { %1109 = vst [vmem:[#allocation3 + $0x188] sm:$0xff] %v1045_v13  ;;  %v590_v16 = vpop.f32.mrf.mxu2  ;;  %v630_v17 = vpop.f32.mrf.mxu3 }
  0xa7   :  { %1062 = vst [vmem:[#allocation3 + $0x10] sm:$0xff] %v998_v14  ;;  %v898_v18 = vmul.f32 %v1552_v38, %v590_v16  ;;  %v914_v19 = vmul.f32 %v1552_v38, %v630_v17  ;;  %v512_v20 = vpop.f32.mrf.mxu0  ;;  %v552_v21 = vpop.f32.mrf.mxu1 }
  0xa8   :  { %1078 = vst [vmem:[#allocation3 + $0x90] sm:$0xff] %v1014_v15  ;;  %v867_v22 = vmul.f32 %v1552_v38, %v512_v20  ;;  %v883_v23 = vmul.f32 %v1552_v38, %v552_v21 }
  0xa9   :  { %v966_v24 = vadd.f32 %v1557_v39, %v898_v18  ;;  %v982_v25 = vadd.f32 %v1557_v39, %v914_v19 }
  0xaa   :  { %v935_v26 = vadd.f32 %v1557_v39, %v867_v22  ;;  %v951_v27 = vadd.f32 %v1557_v39, %v883_v23 }
  0xab   :  { %v1030_v28 = vmax.f32 %v966_v24, 0.0  ;;  %v1046_v29 = vmax.f32 %v982_v25, 0.0 }
  0xac   :  { %v999_v30 = vmax.f32 %v935_v26, 0.0  ;;  %v1015_v31 = vmax.f32 %v951_v27, 0.0 }
  0xad   :  { %1094 = vst [vmem:[#allocation3 + $0x110] sm:$0xff] %v1030_v28 }
  0xae   :  { %1110 = vst [vmem:[#allocation3 + $0x190] sm:$0xff] %v1046_v29  ;;  %v592_v32 = vpop.f32.mrf.mxu2  ;;  %v632_v33 = vpop.f32.mrf.mxu3 }
  0xaf   :  { %1063 = vst [vmem:[#allocation3 + $0x18] sm:$0xff] %v999_v30  ;;  %v899_v34 = vmul.f32 %v1552_v38, %v592_v32  ;;  %v915_v35 = vmul.f32 %v1552_v38, %v632_v33  ;;  %v515_v36 = vpop.f32.mrf.mxu0  ;;  %v555_v37 = vpop.f32.mrf.mxu1 }
  0xb0   :  { %1079 = vst [vmem:[#allocation3 + $0x98] sm:$0xff] %v1015_v31  ;;  %v868_v40 = vmul.f32 %v1552_v38, %v515_v36  ;;  %v884_v41 = vmul.f32 %v1552_v38, %v555_v37 }
  0xb1   :  { %v967_v42 = vadd.f32 %v1557_v39, %v899_v34  ;;  %v983_v43 = vadd.f32 %v1557_v39, %v915_v35 }
  0xb2   :  { %v936_v44 = vadd.f32 %v1557_v39, %v868_v40  ;;  %v952_v45 = vadd.f32 %v1557_v39, %v884_v41 }
  0xb3   :  { %v1031_v46 = vmax.f32 %v967_v42, 0.0  ;;  %v1047_v47 = vmax.f32 %v983_v43, 0.0 }
  0xb4   :  { %v1000_v48 = vmax.f32 %v936_v44, 0.0  ;;  %v1016_v49 = vmax.f32 %v952_v45, 0.0 }
  0xb5   :  { %1095 = vst [vmem:[#allocation3 + $0x118] sm:$0xff] %v1031_v46 }
  0xb6   :  { %1111 = vst [vmem:[#allocation3 + $0x198] sm:$0xff] %v1047_v47  ;;  %v595_v50 = vpop.f32.mrf.mxu2  ;;  %v635_v51 = vpop.f32.mrf.mxu3 }
  0xb7   :  { %1064 = vst [vmem:[#allocation3 + $0x20] sm:$0xff] %v1000_v48  ;;  %v900_v52 = vmul.f32 %v1552_v38, %v595_v50  ;;  %v916_v53 = vmul.f32 %v1552_v38, %v635_v51  ;;  %v517_v54 = vpop.f32.mrf.mxu0  ;;  %v557_v55 = vpop.f32.mrf.mxu1 }
  0xb8   :  { %1080 = vst [vmem:[#allocation3 + $0xa0] sm:$0xff] %v1016_v49  ;;  %v869_v56 = vmul.f32 %v1552_v38, %v517_v54  ;;  %v885_v57 = vmul.f32 %v1552_v38, %v557_v55 }
  0xb9   :  { %v968_v58 = vadd.f32 %v1557_v39, %v900_v52  ;;  %v984_v59 = vadd.f32 %v1557_v39, %v916_v53 }
  0xba   :  { %v937_v60 = vadd.f32 %v1557_v39, %v869_v56  ;;  %v953_v61 = vadd.f32 %v1557_v39, %v885_v57 }
  0xbb   :  { %v1032_v62 = vmax.f32 %v968_v58, 0.0  ;;  %v1048_v63 = vmax.f32 %v984_v59, 0.0 }
  0xbc   :  { %v1001_v0 = vmax.f32 %v937_v60, 0.0  ;;  %v1017_v1 = vmax.f32 %v953_v61, 0.0 }
  0xbd   :  { %1096 = vst [vmem:[#allocation3 + $0x120] sm:$0xff] %v1032_v62 }
  0xbe   :  { %1112 = vst [vmem:[#allocation3 + $0x1a0] sm:$0xff] %v1048_v63  ;;  %v597_v2 = vpop.f32.mrf.mxu2  ;;  %v637_v3 = vpop.f32.mrf.mxu3 }
  0xbf   :  { %1065 = vst [vmem:[#allocation3 + $0x28] sm:$0xff] %v1001_v0  ;;  %v901_v4 = vmul.f32 %v1552_v38, %v597_v2  ;;  %v917_v5 = vmul.f32 %v1552_v38, %v637_v3  ;;  %v520_v6 = vpop.f32.mrf.mxu0  ;;  %v560_v7 = vpop.f32.mrf.mxu1 }
  0xc0   :  { %1081 = vst [vmem:[#allocation3 + $0xa8] sm:$0xff] %v1017_v1  ;;  %v870_v8 = vmul.f32 %v1552_v38, %v520_v6  ;;  %v886_v9 = vmul.f32 %v1552_v38, %v560_v7 }
  0xc1   :  { %v969_v10 = vadd.f32 %v1557_v39, %v901_v4  ;;  %v985_v11 = vadd.f32 %v1557_v39, %v917_v5 }
  0xc2   :  { %v938_v12 = vadd.f32 %v1557_v39, %v870_v8  ;;  %v954_v13 = vadd.f32 %v1557_v39, %v886_v9 }
  0xc3   :  { %v1033_v14 = vmax.f32 %v969_v10, 0.0  ;;  %v1049_v15 = vmax.f32 %v985_v11, 0.0 }
  0xc4   :  { %v1002_v16 = vmax.f32 %v938_v12, 0.0  ;;  %v1018_v17 = vmax.f32 %v954_v13, 0.0 }
  0xc5   :  { %1097 = vst [vmem:[#allocation3 + $0x128] sm:$0xff] %v1033_v14 }
  0xc6   :  { %1113 = vst [vmem:[#allocation3 + $0x1a8] sm:$0xff] %v1049_v15  ;;  %v600_v18 = vpop.f32.mrf.mxu2  ;;  %v640_v19 = vpop.f32.mrf.mxu3 }
  0xc7   :  { %1066 = vst [vmem:[#allocation3 + $0x30] sm:$0xff] %v1002_v16  ;;  %v902_v20 = vmul.f32 %v1552_v38, %v600_v18  ;;  %v918_v21 = vmul.f32 %v1552_v38, %v640_v19  ;;  %v522_v22 = vpop.f32.mrf.mxu0  ;;  %v562_v23 = vpop.f32.mrf.mxu1 }
  0xc8   :  { %1082 = vst [vmem:[#allocation3 + $0xb0] sm:$0xff] %v1018_v17  ;;  %v871_v24 = vmul.f32 %v1552_v38, %v522_v22  ;;  %v887_v25 = vmul.f32 %v1552_v38, %v562_v23 }
  0xc9   :  { %v970_v26 = vadd.f32 %v1557_v39, %v902_v20  ;;  %v986_v27 = vadd.f32 %v1557_v39, %v918_v21 }
  0xca   :  { %v939_v28 = vadd.f32 %v1557_v39, %v871_v24  ;;  %v955_v29 = vadd.f32 %v1557_v39, %v887_v25 }
  0xcb   :  { %v1034_v30 = vmax.f32 %v970_v26, 0.0  ;;  %v1050_v31 = vmax.f32 %v986_v27, 0.0 }
  0xcc   :  { %v1003_v32 = vmax.f32 %v939_v28, 0.0  ;;  %v1019_v33 = vmax.f32 %v955_v29, 0.0 }
  0xcd   :  { %1098 = vst [vmem:[#allocation3 + $0x130] sm:$0xff] %v1034_v30 }
  0xce   :  { %1114 = vst [vmem:[#allocation3 + $0x1b0] sm:$0xff] %v1050_v31  ;;  %v602_v34 = vpop.f32.mrf.mxu2  ;;  %v642_v35 = vpop.f32.mrf.mxu3 }
  0xcf   :  { %1067 = vst [vmem:[#allocation3 + $0x38] sm:$0xff] %v1003_v32  ;;  %v903_v36 = vmul.f32 %v1552_v38, %v602_v34  ;;  %v919_v37 = vmul.f32 %v1552_v38, %v642_v35  ;;  %v525_v40 = vpop.f32.mrf.mxu0  ;;  %v565_v41 = vpop.f32.mrf.mxu1 }
  0xd0   :  { %1083 = vst [vmem:[#allocation3 + $0xb8] sm:$0xff] %v1019_v33  ;;  %v872_v42 = vmul.f32 %v1552_v38, %v525_v40  ;;  %v888_v43 = vmul.f32 %v1552_v38, %v565_v41 }
  0xd1   :  { %v971_v44 = vadd.f32 %v1557_v39, %v903_v36  ;;  %v987_v45 = vadd.f32 %v1557_v39, %v919_v37 }
  0xd2   :  { %v940_v46 = vadd.f32 %v1557_v39, %v872_v42  ;;  %v956_v47 = vadd.f32 %v1557_v39, %v888_v43 }
  0xd3   :  { %v1035_v48 = vmax.f32 %v971_v44, 0.0  ;;  %v1051_v49 = vmax.f32 %v987_v45, 0.0 }
  0xd4   :  { %v1004_v50 = vmax.f32 %v940_v46, 0.0  ;;  %v1020_v51 = vmax.f32 %v956_v47, 0.0 }
  0xd5   :  { %1099 = vst [vmem:[#allocation3 + $0x138] sm:$0xff] %v1035_v48 }
  0xd6   :  { %1115 = vst [vmem:[#allocation3 + $0x1b8] sm:$0xff] %v1051_v49  ;;  %v605_v52 = vpop.f32.mrf.mxu2  ;;  %v645_v53 = vpop.f32.mrf.mxu3 }
  0xd7   :  { %1068 = vst [vmem:[#allocation3 + $0x40] sm:$0xff] %v1004_v50  ;;  %v904_v54 = vmul.f32 %v1552_v38, %v605_v52  ;;  %v920_v55 = vmul.f32 %v1552_v38, %v645_v53  ;;  %v527_v56 = vpop.f32.mrf.mxu0  ;;  %v567_v57 = vpop.f32.mrf.mxu1 }
  0xd8   :  { %1084 = vst [vmem:[#allocation3 + $0xc0] sm:$0xff] %v1020_v51  ;;  %v873_v58 = vmul.f32 %v1552_v38, %v527_v56  ;;  %v889_v59 = vmul.f32 %v1552_v38, %v567_v57 }
  0xd9   :  { %v972_v60 = vadd.f32 %v1557_v39, %v904_v54  ;;  %v988_v61 = vadd.f32 %v1557_v39, %v920_v55 }
  0xda   :  { %v941_v62 = vadd.f32 %v1557_v39, %v873_v58  ;;  %v957_v63 = vadd.f32 %v1557_v39, %v889_v59 }
  0xdb   :  { %v1036_v0 = vmax.f32 %v972_v60, 0.0  ;;  %v1052_v1 = vmax.f32 %v988_v61, 0.0 }
  0xdc   :  { %v1005_v2 = vmax.f32 %v941_v62, 0.0  ;;  %v1021_v3 = vmax.f32 %v957_v63, 0.0 }
  0xdd   :  { %1100 = vst [vmem:[#allocation3 + $0x140] sm:$0xff] %v1036_v0 }
  0xde   :  { %1116 = vst [vmem:[#allocation3 + $0x1c0] sm:$0xff] %v1052_v1  ;;  %v607_v4 = vpop.f32.mrf.mxu2  ;;  %v647_v5 = vpop.f32.mrf.mxu3 }
  0xdf   :  { %1069 = vst [vmem:[#allocation3 + $0x48] sm:$0xff] %v1005_v2  ;;  %v905_v6 = vmul.f32 %v1552_v38, %v607_v4  ;;  %v921_v7 = vmul.f32 %v1552_v38, %v647_v5  ;;  %v530_v8 = vpop.f32.mrf.mxu0  ;;  %v570_v9 = vpop.f32.mrf.mxu1 }
  0xe0   :  { %1085 = vst [vmem:[#allocation3 + $0xc8] sm:$0xff] %v1021_v3  ;;  %v874_v10 = vmul.f32 %v1552_v38, %v530_v8  ;;  %v890_v11 = vmul.f32 %v1552_v38, %v570_v9 }
  0xe1   :  { %v973_v12 = vadd.f32 %v1557_v39, %v905_v6  ;;  %v989_v13 = vadd.f32 %v1557_v39, %v921_v7 }
  0xe2   :  { %v942_v14 = vadd.f32 %v1557_v39, %v874_v10  ;;  %v958_v15 = vadd.f32 %v1557_v39, %v890_v11 }
  0xe3   :  { %v1037_v16 = vmax.f32 %v973_v12, 0.0  ;;  %v1053_v17 = vmax.f32 %v989_v13, 0.0 }
  0xe4   :  { %v1006_v18 = vmax.f32 %v942_v14, 0.0  ;;  %v1022_v19 = vmax.f32 %v958_v15, 0.0 }
  0xe5   :  { %1101 = vst [vmem:[#allocation3 + $0x148] sm:$0xff] %v1037_v16 }
  0xe6   :  { %1117 = vst [vmem:[#allocation3 + $0x1c8] sm:$0xff] %v1053_v17  ;;  %v610_v20 = vpop.f32.mrf.mxu2  ;;  %v650_v21 = vpop.f32.mrf.mxu3 }
  0xe7   :  { %1070 = vst [vmem:[#allocation3 + $0x50] sm:$0xff] %v1006_v18  ;;  %v906_v22 = vmul.f32 %v1552_v38, %v610_v20  ;;  %v922_v23 = vmul.f32 %v1552_v38, %v650_v21  ;;  %v532_v24 = vpop.f32.mrf.mxu0  ;;  %v572_v25 = vpop.f32.mrf.mxu1 }
  0xe8   :  { %1086 = vst [vmem:[#allocation3 + $0xd0] sm:$0xff] %v1022_v19  ;;  %v875_v26 = vmul.f32 %v1552_v38, %v532_v24  ;;  %v891_v27 = vmul.f32 %v1552_v38, %v572_v25 }
  0xe9   :  { %v974_v28 = vadd.f32 %v1557_v39, %v906_v22  ;;  %v990_v29 = vadd.f32 %v1557_v39, %v922_v23 }
  0xea   :  { %v943_v30 = vadd.f32 %v1557_v39, %v875_v26  ;;  %v959_v31 = vadd.f32 %v1557_v39, %v891_v27 }
  0xeb   :  { %v1038_v32 = vmax.f32 %v974_v28, 0.0  ;;  %v1054_v33 = vmax.f32 %v990_v29, 0.0 }
  0xec   :  { %v1007_v34 = vmax.f32 %v943_v30, 0.0  ;;  %v1023_v35 = vmax.f32 %v959_v31, 0.0 }
  0xed   :  { %1102 = vst [vmem:[#allocation3 + $0x150] sm:$0xff] %v1038_v32 }
  0xee   :  { %1118 = vst [vmem:[#allocation3 + $0x1d0] sm:$0xff] %v1054_v33  ;;  %v612_v36 = vpop.f32.mrf.mxu2  ;;  %v652_v37 = vpop.f32.mrf.mxu3 }
  0xef   :  { %1071 = vst [vmem:[#allocation3 + $0x58] sm:$0xff] %v1007_v34  ;;  %v907_v40 = vmul.f32 %v1552_v38, %v612_v36  ;;  %v923_v41 = vmul.f32 %v1552_v38, %v652_v37  ;;  %v535_v42 = vpop.f32.mrf.mxu0  ;;  %v575_v43 = vpop.f32.mrf.mxu1 }
  0xf0   :  { %1087 = vst [vmem:[#allocation3 + $0xd8] sm:$0xff] %v1023_v35  ;;  %v876_v44 = vmul.f32 %v1552_v38, %v535_v42  ;;  %v892_v45 = vmul.f32 %v1552_v38, %v575_v43 }
  0xf1   :  { %v975_v46 = vadd.f32 %v1557_v39, %v907_v40  ;;  %v991_v47 = vadd.f32 %v1557_v39, %v923_v41 }
  0xf2   :  { %v944_v48 = vadd.f32 %v1557_v39, %v876_v44  ;;  %v960_v49 = vadd.f32 %v1557_v39, %v892_v45 }
  0xf3   :  { %v1039_v50 = vmax.f32 %v975_v46, 0.0  ;;  %v1055_v51 = vmax.f32 %v991_v47, 0.0 }
  0xf4   :  { %v1008_v52 = vmax.f32 %v944_v48, 0.0  ;;  %v1024_v53 = vmax.f32 %v960_v49, 0.0 }
  0xf5   :  { %1103 = vst [vmem:[#allocation3 + $0x158] sm:$0xff] %v1039_v50 }
  0xf6   :  { %1119 = vst [vmem:[#allocation3 + $0x1d8] sm:$0xff] %v1055_v51  ;;  %v615_v54 = vpop.f32.mrf.mxu2  ;;  %v655_v55 = vpop.f32.mrf.mxu3 }
  0xf7   :  { %1072 = vst [vmem:[#allocation3 + $0x60] sm:$0xff] %v1008_v52  ;;  %v908_v56 = vmul.f32 %v1552_v38, %v615_v54  ;;  %v924_v57 = vmul.f32 %v1552_v38, %v655_v55  ;;  %v537_v58 = vpop.f32.mrf.mxu0  ;;  %v577_v59 = vpop.f32.mrf.mxu1 }
  0xf8   :  { %1088 = vst [vmem:[#allocation3 + $0xe0] sm:$0xff] %v1024_v53  ;;  %v877_v60 = vmul.f32 %v1552_v38, %v537_v58  ;;  %v893_v61 = vmul.f32 %v1552_v38, %v577_v59 }
  0xf9   :  { %v976_v62 = vadd.f32 %v1557_v39, %v908_v56  ;;  %v992_v63 = vadd.f32 %v1557_v39, %v924_v57 }
  0xfa   :  { %v945_v0 = vadd.f32 %v1557_v39, %v877_v60  ;;  %v961_v1 = vadd.f32 %v1557_v39, %v893_v61 }
  0xfb   :  { %v1040_v2 = vmax.f32 %v976_v62, 0.0  ;;  %v1056_v3 = vmax.f32 %v992_v63, 0.0 }
  0xfc   :  { %v1009_v4 = vmax.f32 %v945_v0, 0.0  ;;  %v1025_v5 = vmax.f32 %v961_v1, 0.0 }
  0xfd   :  { %1104 = vst [vmem:[#allocation3 + $0x160] sm:$0xff] %v1040_v2 }
  0xfe   :  { %1120 = vst [vmem:[#allocation3 + $0x1e0] sm:$0xff] %v1056_v3  ;;  %v617_v6 = vpop.f32.mrf.mxu2  ;;  %v657_v7 = vpop.f32.mrf.mxu3 }
  0xff   :  { %1073 = vst [vmem:[#allocation3 + $0x68] sm:$0xff] %v1009_v4  ;;  %v909_v8 = vmul.f32 %v1552_v38, %v617_v6  ;;  %v925_v9 = vmul.f32 %v1552_v38, %v657_v7  ;;  %v540_v10 = vpop.f32.mrf.mxu0  ;;  %v580_v11 = vpop.f32.mrf.mxu1 }
 0x100   :  { %1089 = vst [vmem:[#allocation3 + $0xe8] sm:$0xff] %v1025_v5  ;;  %v878_v12 = vmul.f32 %v1552_v38, %v540_v10  ;;  %v894_v13 = vmul.f32 %v1552_v38, %v580_v11 }
 0x101   :  { %v977_v14 = vadd.f32 %v1557_v39, %v909_v8  ;;  %v993_v15 = vadd.f32 %v1557_v39, %v925_v9 }
 0x102   :  { %v946_v16 = vadd.f32 %v1557_v39, %v878_v12  ;;  %v962_v17 = vadd.f32 %v1557_v39, %v894_v13 }
 0x103   :  { %v1041_v18 = vmax.f32 %v977_v14, 0.0  ;;  %v1057_v19 = vmax.f32 %v993_v15, 0.0 }
 0x104   :  { %v1010_v20 = vmax.f32 %v946_v16, 0.0  ;;  %v1026_v21 = vmax.f32 %v962_v17, 0.0 }
 0x105   :  { %1105 = vst [vmem:[#allocation3 + $0x168] sm:$0xff] %v1041_v18 }
 0x106   :  { %1121 = vst [vmem:[#allocation3 + $0x1e8] sm:$0xff] %v1057_v19  ;;  %v620_v22 = vpop.f32.mrf.mxu2  ;;  %v660_v23 = vpop.f32.mrf.mxu3 }
 0x107   :  { %1074 = vst [vmem:[#allocation3 + $0x70] sm:$0xff] %v1010_v20  ;;  %v910_v24 = vmul.f32 %v1552_v38, %v620_v22  ;;  %v926_v25 = vmul.f32 %v1552_v38, %v660_v23  ;;  %v542_v26 = vpop.f32.mrf.mxu0  ;;  %v582_v27 = vpop.f32.mrf.mxu1 }
 0x108   :  { %1090 = vst [vmem:[#allocation3 + $0xf0] sm:$0xff] %v1026_v21  ;;  %v879_v28 = vmul.f32 %v1552_v38, %v542_v26  ;;  %v895_v29 = vmul.f32 %v1552_v38, %v582_v27 }
 0x109   :  { %v978_v30 = vadd.f32 %v1557_v39, %v910_v24  ;;  %v994_v31 = vadd.f32 %v1557_v39, %v926_v25 }
 0x10a   :  { %v947_v32 = vadd.f32 %v1557_v39, %v879_v28  ;;  %v963_v33 = vadd.f32 %v1557_v39, %v895_v29 }
 0x10b   :  { %v1042_v34 = vmax.f32 %v978_v30, 0.0  ;;  %v1058_v35 = vmax.f32 %v994_v31, 0.0 }
 0x10c   :  { %v1011_v36 = vmax.f32 %v947_v32, 0.0  ;;  %v1027_v37 = vmax.f32 %v963_v33, 0.0 }
 0x10d   :  { %1106 = vst [vmem:[#allocation3 + $0x170] sm:$0xff] %v1042_v34 }
 0x10e   :  { %1122 = vst [vmem:[#allocation3 + $0x1f0] sm:$0xff] %v1058_v35  ;;  %v622_v40 = vpop.f32.mrf.mxu2  ;;  %v662_v41 = vpop.f32.mrf.mxu3 }
 0x10f   :  { %1075 = vst [vmem:[#allocation3 + $0x78] sm:$0xff] %v1011_v36  ;;  %v911_v42 = vmul.f32 %v1552_v38, %v622_v40  ;;  %v927_v43 = vmul.f32 %v1552_v38, %v662_v41 }
 0x110   :  { %1091 = vst [vmem:[#allocation3 + $0xf8] sm:$0xff] %v1027_v37 }
 0x111   :  { %v979_v44 = vadd.f32 %v1557_v39, %v911_v42  ;;  %v995_v45 = vadd.f32 %v1557_v39, %v927_v43 }
 0x113   :  { %v1043_v46 = vmax.f32 %v979_v44, 0.0  ;;  %v1059_v47 = vmax.f32 %v995_v45, 0.0 }
 0x115   :  { %1107 = vst [vmem:[#allocation3 + $0x178] sm:$0xff] %v1043_v46 }
 0x116   :  { %1123 = vst [vmem:[#allocation3 + $0x1f8] sm:$0xff] %v1059_v47 }
 0x117   :  { %1136 = dma.vmem_to_hbm [thread:$0]  %s1129_s2, 8192, %s1131_s9, [#allocation4], %s1385_s10, %s1385_s10, %s1386_s11  }
 0x118   :  { %1382 = dma.done.wait [#allocation4], 8192  }
 0x119   :  { %1383 = vsyncadd [#allocation4], 4294959104 }
 0x11a   :  { %1141 = vsyncpa [#allocation4], 1 }

</bundles_post_ra>
